<compile_context>
chip_gen: v7x
topology: tpu7x:2x2x1
jax: 0.10.0
libtpu: 0.0.40
codegen_flags: <defaults>
</compile_context>

<pallas_src>
import jax
import jax.numpy as jnp
from jax import lax
from jax.experimental import pallas as pl
from jax.experimental.pallas import tpu as pltpu

# ---- model hyper-parameters (mirror the PyTorch module) ----
HIDDEN = 32          # self.hidden_size
VOCAB = 16           # input_size (embedding rows)
OUT_SIZE = 10        # output_size
BATCH = 2
SEQ = 8


# =====================  fused model kernel  =====================
def fused_lstm_kernel(tok_ref, emb_ref, h0_ref, c0_ref, wih_ref, whh_ref, b_ref,
                      wdec_ref, bdec_ref,
                      logits_ref, hN_ref, cN_ref):
    H, B, T, V = HIDDEN, BATCH, SEQ, VOCAB

    # ---- embedding gather as a one-hot MXU matmul, fused with the input projection ----
    # emb @ W_ih : (V, 4H) done once; then one_hot @ (emb @ W_ih) == x_emb @ W_ih.
    emb_wih = jnp.dot(emb_ref[...], wih_ref[...],
                      preferred_element_type=jnp.float32)            # (V, 4H)
    tok = tok_ref[...]                                                # (T*B, 1) int32, row k = t*B + b
    vocab_iota = lax.broadcasted_iota(jnp.int32, (T * B, V), 1)
    one_hot = (vocab_iota == tok).astype(jnp.float32)                 # (T*B, V)
    gates_x = jnp.dot(one_hot, emb_wih,
                      preferred_element_type=jnp.float32) + b_ref[...]  # (T*B, 4H)

    # lane mask selecting the g-gate columns (PyTorch gate order [i, f, g, o])
    lane = lax.broadcasted_iota(jnp.int32, (B, 4 * H), 1)
    g_cols = (lane >= 2 * H) & (lane < 3 * H)

    h = h0_ref[0]          # (B, H)
    c = c0_ref[0]          # (B, H)
    w_hh = whh_ref[...]    # (H, 4H), hoisted load

    # ---- serial recurrence, fully unrolled (T is static); h_t kept in vregs ----
    hs_rows = [[] for _ in range(B)]
    for t in range(T):
        gates = gates_x[t * B:(t + 1) * B, :] + jnp.dot(
            h, w_hh, preferred_element_type=jnp.float32)              # (B, 4H)
        # single EUP pass: sigmoid everywhere; tanh(g) = 2*sigmoid(2g) - 1
        s = jax.nn.sigmoid(jnp.where(g_cols, 2.0 * gates, gates))
        i_g = s[:, 0 * H:1 * H]
        f_g = s[:, 1 * H:2 * H]
        g_g = 2.0 * s[:, 2 * H:3 * H] - 1.0
        o_g = s[:, 3 * H:4 * H]
        c = f_g * c + i_g * g_g
        h = o_g * jnp.tanh(c)
        for b in range(B):
            hs_rows[b].append(h[b:b + 1, :])                          # stays in vregs

    # final hidden/cell states, written once
    hN_ref[0] = h
    cN_ref[0] = c

    # ---- assemble batch-major hidden slab in registers: row b*T + t ----
    hs_bm = jnp.concatenate([r for b in range(B) for r in hs_rows[b]], axis=0)  # (B*T, H)

    # ---- batched decoder: one (B*T,H)x(H,O) matmul + ONE slab store ----
    logits_ref[...] = (jnp.dot(hs_bm, wdec_ref[...],
                               preferred_element_type=jnp.float32) + bdec_ref[...])


def lstm_model_forward(tokens, prev_hidden, params):
    """tokens: (B, T) int32; prev_hidden = (h0, c0) each (1, B, H)."""
    h0, c0 = prev_hidden
    B, T = tokens.shape
    # time-major token ids: row k = t*B + b  (tiny (T*B,1) int32 array, VMEM resident)
    tokens_tm = tokens.T.reshape(T * B, 1).astype(jnp.int32)
    out_shape = (
        jax.ShapeDtypeStruct((B * T, OUT_SIZE), jnp.float32),   # logits, batch-major
        jax.ShapeDtypeStruct((1, B, HIDDEN), jnp.float32),      # h_n
        jax.ShapeDtypeStruct((1, B, HIDDEN), jnp.float32),      # c_n
    )
    vmem = pl.BlockSpec(memory_space=pltpu.MemorySpace.VMEM)
    logits, h_n, c_n = pl.pallas_call(
        fused_lstm_kernel,
        out_shape=out_shape,
        in_specs=[
            vmem,   # token ids (time-major, int32)
            vmem,   # embedding table
            vmem,   # h0
            vmem,   # c0
            vmem,   # w_ih
            vmem,   # w_hh
            vmem,   # b_lstm (b_ih + b_hh fused)
            vmem,   # w_dec
            vmem,   # b_dec
        ],
        out_specs=(vmem, vmem, vmem),
    )(tokens_tm, params["emb"], h0, c0, params["w_ih"], params["w_hh"],
      params["b_lstm"], params["w_dec"], params["b_dec"])
    return logits, (h_n, c_n)


# =====================  pure-JAX reference  =====================
def reference_forward(tokens, prev_hidden, params):
    h0, c0 = prev_hidden
    x_emb = jnp.take(params["emb"], tokens, axis=0)            # (B, T, H)
    H = HIDDEN

    def step(carry, x_t):
        h, c = carry
        gates = x_t @ params["w_ih"] + h @ params["w_hh"] + params["b_lstm"][0]
        i = jax.nn.sigmoid(gates[:, 0 * H:1 * H])
        f = jax.nn.sigmoid(gates[:, 1 * H:2 * H])
        g = jnp.tanh(gates[:, 2 * H:3 * H])
        o = jax.nn.sigmoid(gates[:, 3 * H:4 * H])
        c_new = f * c + i * g
        h_new = o * jnp.tanh(c_new)
        return (h_new, c_new), h_new

    (h_n, c_n), out_tbh = lax.scan(step, (h0[0], c0[0]),
                                   jnp.transpose(x_emb, (1, 0, 2)))
    out_flat = jnp.transpose(out_tbh, (1, 0, 2)).reshape(-1, H)
    logits = out_flat @ params["w_dec"] + params["b_dec"][0]
    return logits, (h_n[None, ...], c_n[None, ...])


if __name__ == "__main__":
    key = jax.random.PRNGKey(0)
    ks = jax.random.split(key, 8)
    scale = 1.0 / jnp.sqrt(HIDDEN).astype(jnp.float32)

    params = {
        "emb":    jax.random.normal(ks[0], (VOCAB, HIDDEN), jnp.float32) * 0.1,
        "w_ih":   jax.random.uniform(ks[1], (HIDDEN, 4 * HIDDEN), jnp.float32,
                                     -scale, scale),
        "w_hh":   jax.random.uniform(ks[2], (HIDDEN, 4 * HIDDEN), jnp.float32,
                                     -scale, scale),
        "b_lstm": jax.random.uniform(ks[3], (1, 4 * HIDDEN), jnp.float32,
                                     -scale, scale),
        "w_dec":  jax.random.uniform(ks[4], (HIDDEN, OUT_SIZE), jnp.float32,
                                     -scale, scale),
        "b_dec":  jax.random.uniform(ks[5], (1, OUT_SIZE), jnp.float32,
                                     -scale, scale),
    }

    tokens = jax.random.randint(ks[6], (BATCH, SEQ), 0, VOCAB, dtype=jnp.int32)
    h0 = jnp.zeros((1, BATCH, HIDDEN), jnp.float32)
    c0 = jnp.zeros((1, BATCH, HIDDEN), jnp.float32)

    logits, (h_n, c_n) = lstm_model_forward(tokens, (h0, c0), params)
    jax.block_until_ready((logits, h_n, c_n))

    ref_logits, (ref_h, ref_c) = reference_forward(tokens, (h0, c0), params)
    assert logits.shape == (BATCH * SEQ, OUT_SIZE)
    assert h_n.shape == (1, BATCH, HIDDEN) and c_n.shape == (1, BATCH, HIDDEN)
    assert jnp.allclose(logits, ref_logits, atol=1e-4, rtol=1e-4)
    assert jnp.allclose(h_n, ref_h, atol=1e-4, rtol=1e-4)
    assert jnp.allclose(c_n, ref_c, atol=1e-4, rtol=1e-4)

    print("KERNEL_OK")
</pallas_src>

<mosaic_0001>
module attributes {stable_mosaic.version = 11 : i64} {
  func.func @fused_lstm_kernel(%arg0: memref<16x1xi32, #tpu.memory_space<vmem>>, %arg1: memref<16x32xf32, #tpu.memory_space<vmem>>, %arg2: memref<1x2x32xf32, #tpu.memory_space<vmem>>, %arg3: memref<1x2x32xf32, #tpu.memory_space<vmem>>, %arg4: memref<32x128xf32, #tpu.memory_space<vmem>>, %arg5: memref<32x128xf32, #tpu.memory_space<vmem>>, %arg6: memref<1x128xf32, #tpu.memory_space<vmem>>, %arg7: memref<32x10xf32, #tpu.memory_space<vmem>>, %arg8: memref<1x10xf32, #tpu.memory_space<vmem>>, %arg9: memref<16x10xf32, #tpu.memory_space<vmem>>, %arg10: memref<1x2x32xf32, #tpu.memory_space<vmem>>, %arg11: memref<1x2x32xf32, #tpu.memory_space<vmem>>) attributes {dimension_semantics = [], scalar_prefetch = 0 : i64, scratch_operands = 0 : i64, tpu.core_type = #tpu.core_type<tc>} {
    %c0 = arith.constant 0 : index
    %c0_0 = arith.constant 0 : index
    %0 = vector.load %arg1[%c0, %c0_0] : memref<16x32xf32, #tpu.memory_space<vmem>>, vector<16x32xf32>
    %c0_1 = arith.constant 0 : index
    %c0_2 = arith.constant 0 : index
    %1 = vector.load %arg4[%c0_1, %c0_2] : memref<32x128xf32, #tpu.memory_space<vmem>>, vector<32x128xf32>
    %cst = arith.constant dense<0.000000e+00> : vector<16x128xf32>
    %2 = tpu.matmul %0, %1, %cst {dimension_numbers = #tpu.dot_dimension_numbers<[1], [0], [0], [1], [0, 0, 1, 1], [], []>} : vector<16x32xf32>, vector<32x128xf32>, vector<16x128xf32> -> vector<16x128xf32>
    %c0_3 = arith.constant 0 : index
    %c0_4 = arith.constant 0 : index
    %3 = vector.load %arg0[%c0_3, %c0_4] : memref<16x1xi32, #tpu.memory_space<vmem>>, vector<16x1xi32>
    %4 = tpu.iota {dimensions = array<i32: 1>} : vector<16x16xi32>
    %5 = vector.broadcast %3 : vector<16x1xi32> to vector<16x16xi32>
    %6 = arith.cmpi eq, %4, %5 : vector<16x16xi32>
    %7 = arith.extui %6 : vector<16x16xi1> to vector<16x16xi32>
    %8 = arith.sitofp %7 : vector<16x16xi32> to vector<16x16xf32>
    %cst_5 = arith.constant dense<0.000000e+00> : vector<16x128xf32>
    %9 = tpu.matmul %8, %2, %cst_5 {dimension_numbers = #tpu.dot_dimension_numbers<[1], [0], [0], [1], [0, 0, 1, 1], [], []>} : vector<16x16xf32>, vector<16x128xf32>, vector<16x128xf32> -> vector<16x128xf32>
    %c0_6 = arith.constant 0 : index
    %c0_7 = arith.constant 0 : index
    %10 = vector.load %arg6[%c0_6, %c0_7] : memref<1x128xf32, #tpu.memory_space<vmem>>, vector<1x128xf32>
    %11 = vector.broadcast %10 : vector<1x128xf32> to vector<16x128xf32>
    %12 = arith.addf %9, %11 : vector<16x128xf32>
    %13 = tpu.iota {dimensions = array<i32: 1>} : vector<2x128xi32>
    %c64_i32 = arith.constant 64 : i32
    %14 = vector.broadcast %c64_i32 : i32 to vector<2x128xi32>
    %15 = arith.cmpi sge, %13, %14 : vector<2x128xi32>
    %c96_i32 = arith.constant 96 : i32
    %16 = vector.broadcast %c96_i32 : i32 to vector<2x128xi32>
    %17 = arith.cmpi slt, %13, %16 : vector<2x128xi32>
    %18 = arith.andi %15, %17 : vector<2x128xi1>
    %c0_8 = arith.constant 0 : index
    %c0_9 = arith.constant 0 : index
    %c0_10 = arith.constant 0 : index
    %19 = vector.load %arg2[%c0_8, %c0_9, %c0_10] : memref<1x2x32xf32, #tpu.memory_space<vmem>>, vector<1x2x32xf32>
    %20 = vector.shape_cast %19 : vector<1x2x32xf32> to vector<2x32xf32>
    %c0_11 = arith.constant 0 : index
    %c0_12 = arith.constant 0 : index
    %c0_13 = arith.constant 0 : index
    %21 = vector.load %arg3[%c0_11, %c0_12, %c0_13] : memref<1x2x32xf32, #tpu.memory_space<vmem>>, vector<1x2x32xf32>
    %22 = vector.shape_cast %21 : vector<1x2x32xf32> to vector<2x32xf32>
    %c0_14 = arith.constant 0 : index
    %c0_15 = arith.constant 0 : index
    %23 = vector.load %arg5[%c0_14, %c0_15] : memref<32x128xf32, #tpu.memory_space<vmem>>, vector<32x128xf32>
    %24 = vector.extract_strided_slice %12 {offsets = [0, 0], sizes = [2, 128], strides = [1, 1]} : vector<16x128xf32> to vector<2x128xf32>
    %cst_16 = arith.constant dense<0.000000e+00> : vector<2x128xf32>
    %25 = tpu.matmul %20, %23, %cst_16 {dimension_numbers = #tpu.dot_dimension_numbers<[1], [0], [0], [1], [0, 0, 1, 1], [], []>} : vector<2x32xf32>, vector<32x128xf32>, vector<2x128xf32> -> vector<2x128xf32>
    %26 = arith.addf %24, %25 : vector<2x128xf32>
    %cst_17 = arith.constant 2.000000e+00 : f32
    %27 = vector.broadcast %cst_17 : f32 to vector<2x128xf32>
    %28 = arith.mulf %27, %26 : vector<2x128xf32>
    %29 = arith.select %18, %28, %26 : vector<2x128xi1>, vector<2x128xf32>
    %30 = arith.negf %29 : vector<2x128xf32>
    %31 = math.exp %30 : vector<2x128xf32>
    %cst_18 = arith.constant 1.000000e+00 : f32
    %32 = vector.broadcast %cst_18 : f32 to vector<2x128xf32>
    %33 = arith.addf %32, %31 : vector<2x128xf32>
    %34 = arith.divf %32, %33 : vector<2x128xf32>
    %35 = vector.extract_strided_slice %34 {offsets = [0, 0], sizes = [2, 32], strides = [1, 1]} : vector<2x128xf32> to vector<2x32xf32>
    %36 = vector.extract_strided_slice %34 {offsets = [0, 32], sizes = [2, 32], strides = [1, 1]} : vector<2x128xf32> to vector<2x32xf32>
    %37 = vector.extract_strided_slice %34 {offsets = [0, 64], sizes = [2, 32], strides = [1, 1]} : vector<2x128xf32> to vector<2x32xf32>
    %cst_19 = arith.constant 2.000000e+00 : f32
    %38 = vector.broadcast %cst_19 : f32 to vector<2x32xf32>
    %39 = arith.mulf %38, %37 : vector<2x32xf32>
    %cst_20 = arith.constant 1.000000e+00 : f32
    %40 = vector.broadcast %cst_20 : f32 to vector<2x32xf32>
    %41 = arith.subf %39, %40 : vector<2x32xf32>
    %42 = vector.extract_strided_slice %34 {offsets = [0, 96], sizes = [2, 32], strides = [1, 1]} : vector<2x128xf32> to vector<2x32xf32>
    %43 = arith.mulf %36, %22 : vector<2x32xf32>
    %44 = arith.mulf %35, %41 : vector<2x32xf32>
    %45 = arith.addf %43, %44 : vector<2x32xf32>
    %46 = math.tanh %45 : vector<2x32xf32>
    %47 = arith.mulf %42, %46 : vector<2x32xf32>
    %48 = vector.extract_strided_slice %47 {offsets = [0, 0], sizes = [1, 32], strides = [1, 1]} : vector<2x32xf32> to vector<1x32xf32>
    %49 = vector.extract_strided_slice %47 {offsets = [1, 0], sizes = [1, 32], strides = [1, 1]} : vector<2x32xf32> to vector<1x32xf32>
    %50 = vector.extract_strided_slice %12 {offsets = [2, 0], sizes = [2, 128], strides = [1, 1]} : vector<16x128xf32> to vector<2x128xf32>
    %cst_21 = arith.constant dense<0.000000e+00> : vector<2x128xf32>
    %51 = tpu.matmul %47, %23, %cst_21 {dimension_numbers = #tpu.dot_dimension_numbers<[1], [0], [0], [1], [0, 0, 1, 1], [], []>} : vector<2x32xf32>, vector<32x128xf32>, vector<2x128xf32> -> vector<2x128xf32>
    %52 = arith.addf %50, %51 : vector<2x128xf32>
    %cst_22 = arith.constant 2.000000e+00 : f32
    %53 = vector.broadcast %cst_22 : f32 to vector<2x128xf32>
    %54 = arith.mulf %53, %52 : vector<2x128xf32>
    %55 = arith.select %18, %54, %52 : vector<2x128xi1>, vector<2x128xf32>
    %56 = arith.negf %55 : vector<2x128xf32>
    %57 = math.exp %56 : vector<2x128xf32>
    %cst_23 = arith.constant 1.000000e+00 : f32
    %58 = vector.broadcast %cst_23 : f32 to vector<2x128xf32>
    %59 = arith.addf %58, %57 : vector<2x128xf32>
    %60 = arith.divf %58, %59 : vector<2x128xf32>
    %61 = vector.extract_strided_slice %60 {offsets = [0, 0], sizes = [2, 32], strides = [1, 1]} : vector<2x128xf32> to vector<2x32xf32>
    %62 = vector.extract_strided_slice %60 {offsets = [0, 32], sizes = [2, 32], strides = [1, 1]} : vector<2x128xf32> to vector<2x32xf32>
    %63 = vector.extract_strided_slice %60 {offsets = [0, 64], sizes = [2, 32], strides = [1, 1]} : vector<2x128xf32> to vector<2x32xf32>
    %cst_24 = arith.constant 2.000000e+00 : f32
    %64 = vector.broadcast %cst_24 : f32 to vector<2x32xf32>
    %65 = arith.mulf %64, %63 : vector<2x32xf32>
    %cst_25 = arith.constant 1.000000e+00 : f32
    %66 = vector.broadcast %cst_25 : f32 to vector<2x32xf32>
    %67 = arith.subf %65, %66 : vector<2x32xf32>
    %68 = vector.extract_strided_slice %60 {offsets = [0, 96], sizes = [2, 32], strides = [1, 1]} : vector<2x128xf32> to vector<2x32xf32>
    %69 = arith.mulf %62, %45 : vector<2x32xf32>
    %70 = arith.mulf %61, %67 : vector<2x32xf32>
    %71 = arith.addf %69, %70 : vector<2x32xf32>
    %72 = math.tanh %71 : vector<2x32xf32>
    %73 = arith.mulf %68, %72 : vector<2x32xf32>
    %74 = vector.extract_strided_slice %73 {offsets = [0, 0], sizes = [1, 32], strides = [1, 1]} : vector<2x32xf32> to vector<1x32xf32>
    %75 = vector.extract_strided_slice %73 {offsets = [1, 0], sizes = [1, 32], strides = [1, 1]} : vector<2x32xf32> to vector<1x32xf32>
    %76 = vector.extract_strided_slice %12 {offsets = [4, 0], sizes = [2, 128], strides = [1, 1]} : vector<16x128xf32> to vector<2x128xf32>
    %cst_26 = arith.constant dense<0.000000e+00> : vector<2x128xf32>
    %77 = tpu.matmul %73, %23, %cst_26 {dimension_numbers = #tpu.dot_dimension_numbers<[1], [0], [0], [1], [0, 0, 1, 1], [], []>} : vector<2x32xf32>, vector<32x128xf32>, vector<2x128xf32> -> vector<2x128xf32>
    %78 = arith.addf %76, %77 : vector<2x128xf32>
    %cst_27 = arith.constant 2.000000e+00 : f32
    %79 = vector.broadcast %cst_27 : f32 to vector<2x128xf32>
    %80 = arith.mulf %79, %78 : vector<2x128xf32>
    %81 = arith.select %18, %80, %78 : vector<2x128xi1>, vector<2x128xf32>
    %82 = arith.negf %81 : vector<2x128xf32>
    %83 = math.exp %82 : vector<2x128xf32>
    %cst_28 = arith.constant 1.000000e+00 : f32
    %84 = vector.broadcast %cst_28 : f32 to vector<2x128xf32>
    %85 = arith.addf %84, %83 : vector<2x128xf32>
    %86 = arith.divf %84, %85 : vector<2x128xf32>
    %87 = vector.extract_strided_slice %86 {offsets = [0, 0], sizes = [2, 32], strides = [1, 1]} : vector<2x128xf32> to vector<2x32xf32>
    %88 = vector.extract_strided_slice %86 {offsets = [0, 32], sizes = [2, 32], strides = [1, 1]} : vector<2x128xf32> to vector<2x32xf32>
    %89 = vector.extract_strided_slice %86 {offsets = [0, 64], sizes = [2, 32], strides = [1, 1]} : vector<2x128xf32> to vector<2x32xf32>
    %cst_29 = arith.constant 2.000000e+00 : f32
    %90 = vector.broadcast %cst_29 : f32 to vector<2x32xf32>
    %91 = arith.mulf %90, %89 : vector<2x32xf32>
    %cst_30 = arith.constant 1.000000e+00 : f32
    %92 = vector.broadcast %cst_30 : f32 to vector<2x32xf32>
    %93 = arith.subf %91, %92 : vector<2x32xf32>
    %94 = vector.extract_strided_slice %86 {offsets = [0, 96], sizes = [2, 32], strides = [1, 1]} : vector<2x128xf32> to vector<2x32xf32>
    %95 = arith.mulf %88, %71 : vector<2x32xf32>
    %96 = arith.mulf %87, %93 : vector<2x32xf32>
    %97 = arith.addf %95, %96 : vector<2x32xf32>
    %98 = math.tanh %97 : vector<2x32xf32>
    %99 = arith.mulf %94, %98 : vector<2x32xf32>
    %100 = vector.extract_strided_slice %99 {offsets = [0, 0], sizes = [1, 32], strides = [1, 1]} : vector<2x32xf32> to vector<1x32xf32>
    %101 = vector.extract_strided_slice %99 {offsets = [1, 0], sizes = [1, 32], strides = [1, 1]} : vector<2x32xf32> to vector<1x32xf32>
    %102 = vector.extract_strided_slice %12 {offsets = [6, 0], sizes = [2, 128], strides = [1, 1]} : vector<16x128xf32> to vector<2x128xf32>
    %cst_31 = arith.constant dense<0.000000e+00> : vector<2x128xf32>
    %103 = tpu.matmul %99, %23, %cst_31 {dimension_numbers = #tpu.dot_dimension_numbers<[1], [0], [0], [1], [0, 0, 1, 1], [], []>} : vector<2x32xf32>, vector<32x128xf32>, vector<2x128xf32> -> vector<2x128xf32>
    %104 = arith.addf %102, %103 : vector<2x128xf32>
    %cst_32 = arith.constant 2.000000e+00 : f32
    %105 = vector.broadcast %cst_32 : f32 to vector<2x128xf32>
    %106 = arith.mulf %105, %104 : vector<2x128xf32>
    %107 = arith.select %18, %106, %104 : vector<2x128xi1>, vector<2x128xf32>
    %108 = arith.negf %107 : vector<2x128xf32>
    %109 = math.exp %108 : vector<2x128xf32>
    %cst_33 = arith.constant 1.000000e+00 : f32
    %110 = vector.broadcast %cst_33 : f32 to vector<2x128xf32>
    %111 = arith.addf %110, %109 : vector<2x128xf32>
    %112 = arith.divf %110, %111 : vector<2x128xf32>
    %113 = vector.extract_strided_slice %112 {offsets = [0, 0], sizes = [2, 32], strides = [1, 1]} : vector<2x128xf32> to vector<2x32xf32>
    %114 = vector.extract_strided_slice %112 {offsets = [0, 32], sizes = [2, 32], strides = [1, 1]} : vector<2x128xf32> to vector<2x32xf32>
    %115 = vector.extract_strided_slice %112 {offsets = [0, 64], sizes = [2, 32], strides = [1, 1]} : vector<2x128xf32> to vector<2x32xf32>
    %cst_34 = arith.constant 2.000000e+00 : f32
    %116 = vector.broadcast %cst_34 : f32 to vector<2x32xf32>
    %117 = arith.mulf %116, %115 : vector<2x32xf32>
    %cst_35 = arith.constant 1.000000e+00 : f32
    %118 = vector.broadcast %cst_35 : f32 to vector<2x32xf32>
    %119 = arith.subf %117, %118 : vector<2x32xf32>
    %120 = vector.extract_strided_slice %112 {offsets = [0, 96], sizes = [2, 32], strides = [1, 1]} : vector<2x128xf32> to vector<2x32xf32>
    %121 = arith.mulf %114, %97 : vector<2x32xf32>
    %122 = arith.mulf %113, %119 : vector<2x32xf32>
    %123 = arith.addf %121, %122 : vector<2x32xf32>
    %124 = math.tanh %123 : vector<2x32xf32>
    %125 = arith.mulf %120, %124 : vector<2x32xf32>
    %126 = vector.extract_strided_slice %125 {offsets = [0, 0], sizes = [1, 32], strides = [1, 1]} : vector<2x32xf32> to vector<1x32xf32>
    %127 = vector.extract_strided_slice %125 {offsets = [1, 0], sizes = [1, 32], strides = [1, 1]} : vector<2x32xf32> to vector<1x32xf32>
    %128 = vector.extract_strided_slice %12 {offsets = [8, 0], sizes = [2, 128], strides = [1, 1]} : vector<16x128xf32> to vector<2x128xf32>
    %cst_36 = arith.constant dense<0.000000e+00> : vector<2x128xf32>
    %129 = tpu.matmul %125, %23, %cst_36 {dimension_numbers = #tpu.dot_dimension_numbers<[1], [0], [0], [1], [0, 0, 1, 1], [], []>} : vector<2x32xf32>, vector<32x128xf32>, vector<2x128xf32> -> vector<2x128xf32>
    %130 = arith.addf %128, %129 : vector<2x128xf32>
    %cst_37 = arith.constant 2.000000e+00 : f32
    %131 = vector.broadcast %cst_37 : f32 to vector<2x128xf32>
    %132 = arith.mulf %131, %130 : vector<2x128xf32>
    %133 = arith.select %18, %132, %130 : vector<2x128xi1>, vector<2x128xf32>
    %134 = arith.negf %133 : vector<2x128xf32>
    %135 = math.exp %134 : vector<2x128xf32>
    %cst_38 = arith.constant 1.000000e+00 : f32
    %136 = vector.broadcast %cst_38 : f32 to vector<2x128xf32>
    %137 = arith.addf %136, %135 : vector<2x128xf32>
    %138 = arith.divf %136, %137 : vector<2x128xf32>
    %139 = vector.extract_strided_slice %138 {offsets = [0, 0], sizes = [2, 32], strides = [1, 1]} : vector<2x128xf32> to vector<2x32xf32>
    %140 = vector.extract_strided_slice %138 {offsets = [0, 32], sizes = [2, 32], strides = [1, 1]} : vector<2x128xf32> to vector<2x32xf32>
    %141 = vector.extract_strided_slice %138 {offsets = [0, 64], sizes = [2, 32], strides = [1, 1]} : vector<2x128xf32> to vector<2x32xf32>
    %cst_39 = arith.constant 2.000000e+00 : f32
    %142 = vector.broadcast %cst_39 : f32 to vector<2x32xf32>
    %143 = arith.mulf %142, %141 : vector<2x32xf32>
    %cst_40 = arith.constant 1.000000e+00 : f32
    %144 = vector.broadcast %cst_40 : f32 to vector<2x32xf32>
    %145 = arith.subf %143, %144 : vector<2x32xf32>
    %146 = vector.extract_strided_slice %138 {offsets = [0, 96], sizes = [2, 32], strides = [1, 1]} : vector<2x128xf32> to vector<2x32xf32>
    %147 = arith.mulf %140, %123 : vector<2x32xf32>
    %148 = arith.mulf %139, %145 : vector<2x32xf32>
    %149 = arith.addf %147, %148 : vector<2x32xf32>
    %150 = math.tanh %149 : vector<2x32xf32>
    %151 = arith.mulf %146, %150 : vector<2x32xf32>
    %152 = vector.extract_strided_slice %151 {offsets = [0, 0], sizes = [1, 32], strides = [1, 1]} : vector<2x32xf32> to vector<1x32xf32>
    %153 = vector.extract_strided_slice %151 {offsets = [1, 0], sizes = [1, 32], strides = [1, 1]} : vector<2x32xf32> to vector<1x32xf32>
    %154 = vector.extract_strided_slice %12 {offsets = [10, 0], sizes = [2, 128], strides = [1, 1]} : vector<16x128xf32> to vector<2x128xf32>
    %cst_41 = arith.constant dense<0.000000e+00> : vector<2x128xf32>
    %155 = tpu.matmul %151, %23, %cst_41 {dimension_numbers = #tpu.dot_dimension_numbers<[1], [0], [0], [1], [0, 0, 1, 1], [], []>} : vector<2x32xf32>, vector<32x128xf32>, vector<2x128xf32> -> vector<2x128xf32>
    %156 = arith.addf %154, %155 : vector<2x128xf32>
    %cst_42 = arith.constant 2.000000e+00 : f32
    %157 = vector.broadcast %cst_42 : f32 to vector<2x128xf32>
    %158 = arith.mulf %157, %156 : vector<2x128xf32>
    %159 = arith.select %18, %158, %156 : vector<2x128xi1>, vector<2x128xf32>
    %160 = arith.negf %159 : vector<2x128xf32>
    %161 = math.exp %160 : vector<2x128xf32>
    %cst_43 = arith.constant 1.000000e+00 : f32
    %162 = vector.broadcast %cst_43 : f32 to vector<2x128xf32>
    %163 = arith.addf %162, %161 : vector<2x128xf32>
    %164 = arith.divf %162, %163 : vector<2x128xf32>
    %165 = vector.extract_strided_slice %164 {offsets = [0, 0], sizes = [2, 32], strides = [1, 1]} : vector<2x128xf32> to vector<2x32xf32>
    %166 = vector.extract_strided_slice %164 {offsets = [0, 32], sizes = [2, 32], strides = [1, 1]} : vector<2x128xf32> to vector<2x32xf32>
    %167 = vector.extract_strided_slice %164 {offsets = [0, 64], sizes = [2, 32], strides = [1, 1]} : vector<2x128xf32> to vector<2x32xf32>
    %cst_44 = arith.constant 2.000000e+00 : f32
    %168 = vector.broadcast %cst_44 : f32 to vector<2x32xf32>
    %169 = arith.mulf %168, %167 : vector<2x32xf32>
    %cst_45 = arith.constant 1.000000e+00 : f32
    %170 = vector.broadcast %cst_45 : f32 to vector<2x32xf32>
    %171 = arith.subf %169, %170 : vector<2x32xf32>
    %172 = vector.extract_strided_slice %164 {offsets = [0, 96], sizes = [2, 32], strides = [1, 1]} : vector<2x128xf32> to vector<2x32xf32>
    %173 = arith.mulf %166, %149 : vector<2x32xf32>
    %174 = arith.mulf %165, %171 : vector<2x32xf32>
    %175 = arith.addf %173, %174 : vector<2x32xf32>
    %176 = math.tanh %175 : vector<2x32xf32>
    %177 = arith.mulf %172, %176 : vector<2x32xf32>
    %178 = vector.extract_strided_slice %177 {offsets = [0, 0], sizes = [1, 32], strides = [1, 1]} : vector<2x32xf32> to vector<1x32xf32>
    %179 = vector.extract_strided_slice %177 {offsets = [1, 0], sizes = [1, 32], strides = [1, 1]} : vector<2x32xf32> to vector<1x32xf32>
    %180 = vector.extract_strided_slice %12 {offsets = [12, 0], sizes = [2, 128], strides = [1, 1]} : vector<16x128xf32> to vector<2x128xf32>
    %cst_46 = arith.constant dense<0.000000e+00> : vector<2x128xf32>
    %181 = tpu.matmul %177, %23, %cst_46 {dimension_numbers = #tpu.dot_dimension_numbers<[1], [0], [0], [1], [0, 0, 1, 1], [], []>} : vector<2x32xf32>, vector<32x128xf32>, vector<2x128xf32> -> vector<2x128xf32>
    %182 = arith.addf %180, %181 : vector<2x128xf32>
    %cst_47 = arith.constant 2.000000e+00 : f32
    %183 = vector.broadcast %cst_47 : f32 to vector<2x128xf32>
    %184 = arith.mulf %183, %182 : vector<2x128xf32>
    %185 = arith.select %18, %184, %182 : vector<2x128xi1>, vector<2x128xf32>
    %186 = arith.negf %185 : vector<2x128xf32>
    %187 = math.exp %186 : vector<2x128xf32>
    %cst_48 = arith.constant 1.000000e+00 : f32
    %188 = vector.broadcast %cst_48 : f32 to vector<2x128xf32>
    %189 = arith.addf %188, %187 : vector<2x128xf32>
    %190 = arith.divf %188, %189 : vector<2x128xf32>
    %191 = vector.extract_strided_slice %190 {offsets = [0, 0], sizes = [2, 32], strides = [1, 1]} : vector<2x128xf32> to vector<2x32xf32>
    %192 = vector.extract_strided_slice %190 {offsets = [0, 32], sizes = [2, 32], strides = [1, 1]} : vector<2x128xf32> to vector<2x32xf32>
    %193 = vector.extract_strided_slice %190 {offsets = [0, 64], sizes = [2, 32], strides = [1, 1]} : vector<2x128xf32> to vector<2x32xf32>
    %cst_49 = arith.constant 2.000000e+00 : f32
    %194 = vector.broadcast %cst_49 : f32 to vector<2x32xf32>
    %195 = arith.mulf %194, %193 : vector<2x32xf32>
    %cst_50 = arith.constant 1.000000e+00 : f32
    %196 = vector.broadcast %cst_50 : f32 to vector<2x32xf32>
    %197 = arith.subf %195, %196 : vector<2x32xf32>
    %198 = vector.extract_strided_slice %190 {offsets = [0, 96], sizes = [2, 32], strides = [1, 1]} : vector<2x128xf32> to vector<2x32xf32>
    %199 = arith.mulf %192, %175 : vector<2x32xf32>
    %200 = arith.mulf %191, %197 : vector<2x32xf32>
    %201 = arith.addf %199, %200 : vector<2x32xf32>
    %202 = math.tanh %201 : vector<2x32xf32>
    %203 = arith.mulf %198, %202 : vector<2x32xf32>
    %204 = vector.extract_strided_slice %203 {offsets = [0, 0], sizes = [1, 32], strides = [1, 1]} : vector<2x32xf32> to vector<1x32xf32>
    %205 = vector.extract_strided_slice %203 {offsets = [1, 0], sizes = [1, 32], strides = [1, 1]} : vector<2x32xf32> to vector<1x32xf32>
    %206 = vector.extract_strided_slice %12 {offsets = [14, 0], sizes = [2, 128], strides = [1, 1]} : vector<16x128xf32> to vector<2x128xf32>
    %cst_51 = arith.constant dense<0.000000e+00> : vector<2x128xf32>
    %207 = tpu.matmul %203, %23, %cst_51 {dimension_numbers = #tpu.dot_dimension_numbers<[1], [0], [0], [1], [0, 0, 1, 1], [], []>} : vector<2x32xf32>, vector<32x128xf32>, vector<2x128xf32> -> vector<2x128xf32>
    %208 = arith.addf %206, %207 : vector<2x128xf32>
    %cst_52 = arith.constant 2.000000e+00 : f32
    %209 = vector.broadcast %cst_52 : f32 to vector<2x128xf32>
    %210 = arith.mulf %209, %208 : vector<2x128xf32>
    %211 = arith.select %18, %210, %208 : vector<2x128xi1>, vector<2x128xf32>
    %212 = arith.negf %211 : vector<2x128xf32>
    %213 = math.exp %212 : vector<2x128xf32>
    %cst_53 = arith.constant 1.000000e+00 : f32
    %214 = vector.broadcast %cst_53 : f32 to vector<2x128xf32>
    %215 = arith.addf %214, %213 : vector<2x128xf32>
    %216 = arith.divf %214, %215 : vector<2x128xf32>
    %217 = vector.extract_strided_slice %216 {offsets = [0, 0], sizes = [2, 32], strides = [1, 1]} : vector<2x128xf32> to vector<2x32xf32>
    %218 = vector.extract_strided_slice %216 {offsets = [0, 32], sizes = [2, 32], strides = [1, 1]} : vector<2x128xf32> to vector<2x32xf32>
    %219 = vector.extract_strided_slice %216 {offsets = [0, 64], sizes = [2, 32], strides = [1, 1]} : vector<2x128xf32> to vector<2x32xf32>
    %cst_54 = arith.constant 2.000000e+00 : f32
    %220 = vector.broadcast %cst_54 : f32 to vector<2x32xf32>
    %221 = arith.mulf %220, %219 : vector<2x32xf32>
    %cst_55 = arith.constant 1.000000e+00 : f32
    %222 = vector.broadcast %cst_55 : f32 to vector<2x32xf32>
    %223 = arith.subf %221, %222 : vector<2x32xf32>
    %224 = vector.extract_strided_slice %216 {offsets = [0, 96], sizes = [2, 32], strides = [1, 1]} : vector<2x128xf32> to vector<2x32xf32>
    %225 = arith.mulf %218, %201 : vector<2x32xf32>
    %226 = arith.mulf %217, %223 : vector<2x32xf32>
    %227 = arith.addf %225, %226 : vector<2x32xf32>
    %228 = math.tanh %227 : vector<2x32xf32>
    %229 = arith.mulf %224, %228 : vector<2x32xf32>
    %230 = vector.extract_strided_slice %229 {offsets = [0, 0], sizes = [1, 32], strides = [1, 1]} : vector<2x32xf32> to vector<1x32xf32>
    %231 = vector.extract_strided_slice %229 {offsets = [1, 0], sizes = [1, 32], strides = [1, 1]} : vector<2x32xf32> to vector<1x32xf32>
    %c0_56 = arith.constant 0 : index
    %c0_57 = arith.constant 0 : index
    %c0_58 = arith.constant 0 : index
    %232 = vector.load %arg10[%c0_56, %c0_57, %c0_58] : memref<1x2x32xf32, #tpu.memory_space<vmem>>, vector<1x2x32xf32>
    %233 = vector.shape_cast %232 : vector<1x2x32xf32> to vector<2x32xf32>
    %234 = vector.shape_cast %229 : vector<2x32xf32> to vector<1x2x32xf32>
    tpu.vector_store %arg10[%c0_56, %c0_57, %c0_58], %234 {strides = array<i32>} : memref<1x2x32xf32, #tpu.memory_space<vmem>>, vector<1x2x32xf32>,
    %c0_59 = arith.constant 0 : index
    %c0_60 = arith.constant 0 : index
    %c0_61 = arith.constant 0 : index
    %235 = vector.load %arg11[%c0_59, %c0_60, %c0_61] : memref<1x2x32xf32, #tpu.memory_space<vmem>>, vector<1x2x32xf32>
    %236 = vector.shape_cast %235 : vector<1x2x32xf32> to vector<2x32xf32>
    %237 = vector.shape_cast %227 : vector<2x32xf32> to vector<1x2x32xf32>
    tpu.vector_store %arg11[%c0_59, %c0_60, %c0_61], %237 {strides = array<i32>} : memref<1x2x32xf32, #tpu.memory_space<vmem>>, vector<1x2x32xf32>,
    %238 = tpu.concatenate %48, %74, %100, %126, %152, %178, %204, %230, %49, %75, %101, %127, %153, %179, %205, %231 in 0 : vector<1x32xf32>, vector<1x32xf32>, vector<1x32xf32>, vector<1x32xf32>, vector<1x32xf32>, vector<1x32xf32>, vector<1x32xf32>, vector<1x32xf32>, vector<1x32xf32>, vector<1x32xf32>, vector<1x32xf32>, vector<1x32xf32>, vector<1x32xf32>, vector<1x32xf32>, vector<1x32xf32>, vector<1x32xf32> -> vector<16x32xf32>
    %c0_62 = arith.constant 0 : index
    %c0_63 = arith.constant 0 : index
    %239 = vector.load %arg7[%c0_62, %c0_63] : memref<32x10xf32, #tpu.memory_space<vmem>>, vector<32x10xf32>
    %cst_64 = arith.constant dense<0.000000e+00> : vector<16x10xf32>
    %240 = tpu.matmul %238, %239, %cst_64 {dimension_numbers = #tpu.dot_dimension_numbers<[1], [0], [0], [1], [0, 0, 1, 1], [], []>} : vector<16x32xf32>, vector<32x10xf32>, vector<16x10xf32> -> vector<16x10xf32>
    %c0_65 = arith.constant 0 : index
    %c0_66 = arith.constant 0 : index
    %241 = vector.load %arg8[%c0_65, %c0_66] : memref<1x10xf32, #tpu.memory_space<vmem>>, vector<1x10xf32>
    %242 = vector.broadcast %241 : vector<1x10xf32> to vector<16x10xf32>
    %243 = arith.addf %240, %242 : vector<16x10xf32>
    %c0_67 = arith.constant 0 : index
    %c0_68 = arith.constant 0 : index
    %244 = vector.load %arg9[%c0_67, %c0_68] : memref<16x10xf32, #tpu.memory_space<vmem>>, vector<16x10xf32>
    tpu.vector_store %arg9[%c0_67, %c0_68], %243 {strides = array<i32>} : memref<16x10xf32, #tpu.memory_space<vmem>>, vector<16x10xf32>,
    return
  }
}

</mosaic_0001>

<bundles_post_ra>
// kernel: tpu_custom_call.1
= control target key start
LH: loop header
LB: loop body
LE: loop exit
PB: predicated region body
PF: predicated region fallthrough
CT: control target
= control target key end

     0   :  { %17 = vsyncpa [#allocation3], 0  ;;  %s2174_s0 = inlined_call_operand.vmem [shape: s32[16,1], index: 0, kind: input, shape index: {}]   ;;  %s2175_s1 = inlined_call_operand.hbm [shape: f32[16,32], index: 1, kind: input, shape index: {}]   ;;  %s2176_s2 = inlined_call_operand.hbm [shape: f32[1,2,32], index: 2, kind: input, shape index: {}]   ;;  %s2177_s3 = inlined_call_operand.hbm [shape: f32[1,2,32], index: 3, kind: input, shape index: {}]   ;;  %s2178_s4 = inlined_call_operand.vmem [shape: f32[32,128], index: 4, kind: input, shape index: {}]   ;;  %s2179_s5 = inlined_call_operand.vmem [shape: f32[32,128], index: 5, kind: input, shape index: {}]   ;;  %s2180_s6 = inlined_call_operand.vmem [shape: f32[1,128], index: 6, kind: input, shape index: {}]   ;;  %s2181_s7 = inlined_call_operand.vmem [shape: f32[32,10], index: 7, kind: input, shape index: {}]   ;;  %s2182_s8 = inlined_call_operand.vmem [shape: f32[1,10], index: 8, kind: input, shape index: {}]   ;;  %s2183_s9 = inlined_call_operand.hbm [shape: f32[16,10], index: 9, kind: output, shape index: {0}]   ;;  %s2184_s10 = inlined_call_operand.hbm [shape: f32[1,2,32], index: 10, kind: output, shape index: {1}]   ;;  %s2185_s11 = inlined_call_operand.hbm [shape: f32[1,2,32], index: 11, kind: output, shape index: {2}]  }
   0x1   :  { %18 = vsyncpa [#allocation6], 0 }
   0x2   :  { %19 = vsyncpa [#allocation4], 0 }
   0x3   :  { %20 = vsyncpa [#allocation10], 0  ;;  %s1828_s17 = smov [#allocation5]   ;;  %s1829_s19 = smov [#allocation2]  }
   0x4   :  { %s41_s18 = sshll.u32 %s1828_s17, 4  ;;  %s28_s20 = sshll.u32 %s1829_s19, 4  ;;  %s42_s18 = int_to_ptr.vmem [resolvable:$true] %s41_s18  ;;  %s1903_s20 = int_to_ptr.vmem [resolvable:$true] %s28_s20 }
   0x5   :  { %s1688_s23 = scalar_lea.hbm %s2176_s2, 32 }
   0x6   :  { %p1689_p0 = scmp.ne.s32.totalorder %s2176_s2, %s1688_s23  ;;  %p1692_p1 = scmp.lt.u32.totalorder %s1688_s23, %s2176_s2 }
   0x8   :  { %p1694_p2 = pnand %p1692_p1, %p1689_p0 }
   0xa   :  { %1697 = shalt.err (!%p1694_p2)
}
   0xb   :  { %s1698_s28 = scalar_lea.vmem %s42_s18, 32  ;;  %p1703_p4 = scmp.lt.s32.totalorder %s42_s18, %s42_s18 }
   0xc   :  { %p1699_p3 = scmp.ne.s32.totalorder %s42_s18, %s1698_s28  ;;  %p1704_p5 = scmp.lt.s32.totalorder %s1698_s28, %s1698_s28 }
   0xe   :  { %p1705_p6 = por %p1704_p5, %p1703_p4 }
  0x10   :  { %p1706_p7 = pnand %p1705_p6, %p1699_p3 }
  0x12   :  { %1709 = shalt.err (!%p1706_p7)
}
  0x13   :  { %44 = dma.hbm_to_vmem [thread:$0]  %s2176_s2, 32, %s42_s18, [#allocation6]  }
  0x14   :  { %s1710_s14 = scalar_lea.hbm %s2175_s1, 256 }
  0x15   :  { %p1711_p8 = scmp.ne.s32.totalorder %s2175_s1, %s1710_s14  ;;  %p1714_p9 = scmp.lt.u32.totalorder %s1710_s14, %s2175_s1 }
  0x17   :  { %p1716_p10 = pnand %p1714_p9, %p1711_p8 }
  0x19   :  { %1719 = shalt.err (!%p1716_p10)
}
  0x1a   :  { %s1720_s21 = scalar_lea.vmem %s1903_s20, 256  ;;  %p1725_p12 = scmp.lt.s32.totalorder %s1903_s20, %s1903_s20 }
  0x1b   :  { %p1721_p11 = scmp.ne.s32.totalorder %s1903_s20, %s1720_s21  ;;  %p1726_p13 = scmp.lt.s32.totalorder %s1720_s21, %s1720_s21 }
  0x1d   :  { %p1727_p0 = por %p1726_p13, %p1725_p12 }
  0x1f   :  { %p1728_p1 = pnand %p1727_p0, %p1721_p11 }
  0x21   :  { %1731 = shalt.err (!%p1728_p1)
}
  0x22   :  { %s1830_s2 = smov 128   ;;  %s1831_s18 = smov 8  }
  0x23   :  { %34 = dma.hbm_to_vmem [thread:$0]  %s2175_s1, 256, %s1903_s20, [#allocation3], %s1830_s2, %s1830_s2, %s1831_s18  }
  0x24   :  { %s1832_s24 = smov [#allocation7]   ;;  %s1732_s28 = scalar_lea.hbm %s2177_s3, 32 }
  0x25   :  { %s51_s25 = sshll.u32 %s1832_s24, 4  ;;  %p1733_p2 = scmp.ne.s32.totalorder %s2177_s3, %s1732_s28  ;;  %s52_s25 = int_to_ptr.vmem [resolvable:$true] %s51_s25 }
  0x26   :  { %p1736_p3 = scmp.lt.u32.totalorder %s1732_s28, %s2177_s3 }
  0x28   :  { %p1738_p4 = pnand %p1736_p3, %p1733_p2 }
  0x2a   :  { %1741 = shalt.err (!%p1738_p4)
}
  0x2b   :  { %s1742_s14 = scalar_lea.vmem %s52_s25, 32  ;;  %p1747_p6 = scmp.lt.s32.totalorder %s52_s25, %s52_s25 }
  0x2c   :  { %p1743_p5 = scmp.ne.s32.totalorder %s52_s25, %s1742_s14  ;;  %p1748_p7 = scmp.lt.s32.totalorder %s1742_s14, %s1742_s14 }
  0x2e   :  { %p1749_p8 = por %p1748_p7, %p1747_p6 }
  0x30   :  { %p1750_p9 = pnand %p1749_p8, %p1743_p5 }
  0x32   :  { %1753 = shalt.err (!%p1750_p9)
}
  0x33   :  { %54 = dma.hbm_to_vmem [thread:$0]  %s2177_s3, 32, %s52_s25, [#allocation6]  }
  0x34   :  { %1820 = dma.done.wait [#allocation3], 256  }
  0x35   :  { %1821 = vsyncadd [#allocation3], 4294967040 }
  0x36   :  { %1822 = dma.done.wait [#allocation6], 64  }
  0x37   :  { %1823 = vsyncadd [#allocation6], 4294967232  ;;  %v1833_v0 = vmov 0   ;;  %vm80_vm0 = vcmask 261120   ;;  %v76_v1 = vld [vmem:[%s2178_s4] sm:$0xff]  ;;  %v77_v2 = vld [vmem:[%s2178_s4 + $0x8] sm:$0xff]  ;;  %v164_v19 = vlaneseq }
  0x38   :  { %1639 = vset.pattern.permute.xlu0 %v1833_v0  ;;  %v78_v3 = vld [vmem:[%s2178_s4 + $0x10] sm:$0xff]  ;;  %v1556_v4 = vpack.c.bf16 %v77_v2, %v76_v1  ;;  %v79_v5 = vld [vmem:[%s2178_s4 + $0x18] sm:$0xff]  ;;  %v74_v6 = vld [vmem:[#allocation2] sm:$0xff]  ;;  %v1834_v14 = vmov 0.0|0.0   ;;  %vm1835_vm1 = vmmov 0   ;;  %v1836_v18 = vmov 0.0  }
  0x39   :  { %v1560_v7 = vpack.c.bf16 %v79_v5, %v78_v3  ;;  %1447 = vmatprep.mubr.msk.f32.mxu0 %vm80_vm0, %v74_v6  ;;  %v162_v8 = vld [vmem:[%s2174_s0] sm:$0xff]  ;;  %v163_v9 = vld [vmem:[%s2174_s0 + $0x8] sm:$0xff]  ;;  %v274_v15 = vld [vmem:[%s2179_s5 + $0x10] sm:$0xff]  ;;  %v165_v20 = vand.u32 127, %v164_v19  ;;  %vm185_vm2 = vcmask 130048   ;;  %s1838_s20 = smov 32  }
  0x3a   :  { %1557 = vmatprep.subr.bf16.mxu0 %v1556_v4  ;;  %167 = vperm.xlu0 %1639, %v162_v8   ;;  %v75_v10 = vld [vmem:[#allocation2 + $0x8] sm:$0xff]  ;;  %v272_v11 = vld [vmem:[%s2179_s5] sm:$0xff]  ;;  %v275_v16 = vld [vmem:[%s2179_s5 + $0x18] sm:$0xff]  ;;  %vm1184_vm8 = vcmask 1040384   ;;  %vm1186_vm9 = vcmask 1041408   ;;  %vm1188_vm10 = vcmask 1042432  }
  0x3b   :  { %1559 = vmatpush3.bf16.msra.mxu0 %v1556_v4  ;;  %v273_v12 = vld [vmem:[%s2179_s5 + $0x8] sm:$0xff]  ;;  %v1986_v17 = vpack.c.bf16 %v275_v16, %v274_v15  ;;  %v270_v28 = vld [vmem:[#allocation5] sm:$0x3]  ;;  %v1353_v29 = vld [vmem:[%s2180_s6] ss:$0 sm:$0xff]  ;;  %vm267_vm5 = vcmp.ge.s32.totalorder %v165_v20, 64 }
  0x3c   :  { %1561 = vmatprep.subr.bf16.mxu0 %v1560_v7  ;;  %v1975_v13 = vpack.c.bf16 %v273_v12, %v272_v11  ;;  %vm268_vm6 = vcmp.lt.s32.totalorder %v165_v20, 96  ;;  %s1837_s6 = smov 64   ;;  %v271_v46 = vld [vmem:[#allocation7] sm:$0x3]  ;;  %vm1190_vm11 = vcmask 1043456   ;;  %vm1192_vm12 = vcmask 1044480  }
  0x3d   :  { %vm2016_vm7 = vmand %vm267_vm5, %vm268_vm6  ;;  %vm1194_vm13 = vcmask 1045504   ;;  %v1205_v37 = vld [vmem:[%s2181_s7] sm:$0xff]  ;;  %vm1196_vm14 = vcmask 1046528   ;;  %s1839_s24 = smov 96   ;;  %vm1150_vm15 = vcmask 261126  }
  0x3e   :  { %170 = vperm.xlu0 %1639, %v163_v9  }
  0x3f   :  { %1563 = vmatpush3.bf16.msra.mxu0 %v1560_v7 }
  0x40   :  { %1574 = vmatprep.subr.bf16.mxu0 %v1834_v14 }
  0x42   :  { %1448 = vmatmul.mubr.msk.f32.vlgmr.msra.gmra.mrb[0].mxu0 %vm80_vm0, %v75_v10 }
  0x43   :  { %1576 = vmatpush3.bf16.msra.mxu0 %v1975_v13  ;;  %1476 = vmatprep.mubr.msk.f32.mxu0 %vm1835_vm1, %v1836_v18 }
  0x44   :  { %1577 = vmatprep.subr.bf16.mxu0 %v1834_v14 }
  0x47   :  { %1579 = vmatpush3.bf16.msra.mxu0 %v1986_v17 }
  0x48   :  { %1586 = vmatprep.subr.bf16.mxu0 %v1834_v14 }
  0xb9   :  { %v168_v21 = vpop.permute.xlu0 %167 }
  0xba   :  { %vm172_vm3 = vcmp.eq.s32.totalorder %v165_v20, %v168_v21 }
  0xbb   :  { %v1351_v22 = vsel %vm172_vm3, 1.0, %v1836_v18 }
  0xbc   :  { %1454 = vmatprep.mubr.msk.f32.mxu1 %vm185_vm2, %v1351_v22 }
  0xbd   :  { %v171_v25 = vpop.permute.xlu0 %170 }
  0xbe   :  { %vm173_vm4 = vcmp.eq.s32.totalorder %v165_v20, %v171_v25 }
  0xbf   :  { %v1352_v27 = vsel %vm173_vm4, 1.0, %v1836_v18 }
 0x115   :  { %v1449_v23 = vpop.f32.mrb[0].mxu0 }
 0x116   :  { %v153_v24 = vpop.f32.mrb[1].mxu0 }
 0x117   :  { %v1564_v26 = vpack.c.bf16 %v1449_v23, %v153_v24 }
 0x119   :  { %1565 = vmatprep.subr.bf16.mxu1 %v1564_v26 }
 0x11a   :  { %1567 = vmatpush3.bf16.msra.mxu1 %v1564_v26 }
 0x11b   :  { %1568 = vmatprep.subr.bf16.mxu1 %v1834_v14 }
 0x11d   :  { %1455 = vmatmul.mubr.msk.f32.vlgmr.msra.gmra.mrb[0].mxu1 %vm185_vm2, %v1352_v27 }
 0x11e   :  { %1570 = vmatpush3.bf16.msra.mxu1 %v1975_v13  ;;  %1465 = vmatprep.mubr.msk.f32.mxu1 %vm1835_vm1, %v1836_v18 }
 0x11f   :  { %1571 = vmatprep.subr.bf16.mxu1 %v1834_v14 }
 0x122   :  { %1573 = vmatpush3.bf16.msra.mxu1 %v1986_v17 }
 0x123   :  { %1580 = vmatprep.subr.bf16.mxu1 %v1834_v14 }
 0x125   :  { %1466 = vmatmul.mubr.msk.f32.vlgmr.msra.gmra.mrb[2].mxu1 %vm80_vm0, %v270_v28 }
 0x126   :  { %1582 = vmatpush3.bf16.msra.mxu1 %v1975_v13  ;;  %1487 = vmatprep.mubr.msk.f32.mxu1 %vm1835_vm1, %v1836_v18 }
 0x127   :  { %1583 = vmatprep.subr.bf16.mxu1 %v1834_v14 }
 0x12a   :  { %1585 = vmatpush3.bf16.msra.mxu1 %v1986_v17 }
 0x12b   :  { %1592 = vmatprep.subr.bf16.mxu1 %v1834_v14 }
 0x1f0   :  { %v1456_v30 = vpop.f32.mrb[0].mxu1 }
 0x1f1   :  { %v2011_v31 = vadd.f32 %v1456_v30, %v1353_v29  ;;  %v258_v32 = vpop.f32.mrb[1].mxu1 }
 0x1f2   :  { %v2013_v33 = vadd.f32 %v1353_v29, %v258_v32 }
 0x1f8   :  { %v345_v34 = vpop.f32.mrb[2].mxu1 }
 0x1f9   :  { %v349_v35 = vadd.f32 %v345_v34, %v2013_v33  ;;  %v1467_v36 = vpop.f32.mrb[3].mxu1 }
 0x1fb   :  { %v350_v38 = vmul.f32 2.0, %v349_v35 }
 0x1fd   :  { %v351_v39 = vsel %vm2016_vm7, %v350_v38, %v349_v35 }
 0x1fe   :  { %v1357_v40 = vmul.f32 -1.442695, %v351_v39 }
 0x200   :  { %1640 = vpow2.f32 %v1357_v40 }
 0x20a   :  { %v1641_v41 = vpop.eup %1640 }
 0x20b   :  { %v355_v42 = vadd.f32 1.0, %v1641_v41 }
 0x20d   :  { %1642 = vrcp.f32 %v355_v42 }
 0x217   :  { %v1643_v43 = vpop.eup %1642 }
 0x218   :  { %v358_v44 = vmul.f32 2.0, %v1643_v43 }
 0x21a   :  { %v1358_v45 = vadd.f32 -1.0, %v358_v44 }
 0x21c   :  { %366 = vrot.lane.b32.xlu1 %v1358_v45, %s1837_s6 }
 0x220   :  { %361 = vrot.lane.b32.xlu1 %v271_v46, %s1838_s20 }
 0x28e   :  { %v367_v47 = vpop.permute.xlu1 %366 }
 0x28f   :  { %v369_v48 = vmul.f32 %v1643_v43, %v367_v47 }
 0x291   :  { %371 = vrot.lane.b32.xlu0 %v369_v48, %s1838_s20 }
 0x292   :  { %v362_v49 = vpop.permute.xlu1 %361 }
 0x293   :  { %v364_v50 = vmul.f32 %v1643_v43, %v362_v49 }
 0x303   :  { %v372_v51 = vpop.permute.xlu0 %371 }
 0x304   :  { %v374_v52 = vadd.f32 %v372_v51, %v364_v50 }
 0x306   :  { %1644 = vtanh.f32 %v374_v52  ;;  %v471_v7 = vrot.slane %v374_v52, 6 }
 0x310   :  { %v1645_v53 = vpop.eup %1644 }
 0x311   :  { %377 = vrot.lane.b32.xlu1 %v1645_v53, %s1837_s6 }
 0x383   :  { %v378_v54 = vpop.permute.xlu1 %377 }
 0x384   :  { %v2026_v55 = vmul.f32 %v1643_v43, %v378_v54 }
 0x386   :  { %382 = vrot.lane.b32.xlu0 %v2026_v55, %s1838_s20  ;;  %v1171_v45 = vrot.slane %v2026_v55, 1 }
 0x3f8   :  { %v383_v56 = vpop.permute.xlu0 %382 }
 0x3f9   :  { %1477 = vmatmul.mubr.msk.f32.vlgmr.msra.gmra.mrb[2].mxu0 %vm80_vm0, %v383_v56 }
 0x3fa   :  { %1588 = vmatpush3.bf16.msra.mxu0 %v1975_v13  ;;  %1498 = vmatprep.mubr.msk.f32.mxu0 %vm1835_vm1, %v1836_v18 }
 0x3fb   :  { %1589 = vmatprep.subr.bf16.mxu0 %v1834_v14 }
 0x3fe   :  { %1591 = vmatpush3.bf16.msra.mxu0 %v1986_v17 }
 0x3ff   :  { %1598 = vmatprep.subr.bf16.mxu0 %v1834_v14 }
 0x4cc   :  { %v452_v57 = vpop.f32.mrb[2].mxu0 }
 0x4cd   :  { %v457_v58 = vrot.slane %v452_v57, 6  ;;  %v1478_v59 = vpop.f32.mrb[3].mxu0 }
 0x4cf   :  { %v459_v60 = vadd.f32 %v457_v58, %v2013_v33 }
 0x4d1   :  { %v460_v61 = vmul.f32 2.0, %v459_v60 }
 0x4d3   :  { %v461_v62 = vsel %vm2016_vm7, %v460_v61, %v459_v60 }
 0x4d4   :  { %v1360_v63 = vmul.f32 -1.442695, %v461_v62 }
 0x4d6   :  { %1646 = vpow2.f32 %v1360_v63 }
 0x4e0   :  { %v1647_v0 = vpop.eup %1646 }
 0x4e1   :  { %v465_v1 = vadd.f32 1.0, %v1647_v0 }
 0x4e3   :  { %1648 = vrcp.f32 %v465_v1 }
 0x4ed   :  { %v1649_v2 = vpop.eup %1648 }
 0x4ee   :  { %v468_v3 = vmul.f32 2.0, %v1649_v2  ;;  %v473_v8 = vmul.f32 %v1649_v2, %v471_v7 }
 0x4f0   :  { %v1361_v4 = vadd.f32 -1.0, %v468_v3 }
 0x4f2   :  { %475 = vrot.lane.b32.xlu1 %v1361_v4, %s1837_s6 }
 0x564   :  { %v476_v5 = vpop.permute.xlu1 %475 }
 0x565   :  { %v478_v6 = vmul.f32 %v1649_v2, %v476_v5 }
 0x567   :  { %480 = vrot.lane.b32.xlu0 %v478_v6, %s1838_s20 }
 0x5d9   :  { %v481_v9 = vpop.permute.xlu0 %480 }
 0x5da   :  { %v483_v10 = vadd.f32 %v481_v9, %v473_v8 }
 0x5dc   :  { %1650 = vtanh.f32 %v483_v10  ;;  %v581_v36 = vrot.slane %v483_v10, 6 }
 0x5e6   :  { %v1651_v11 = vpop.eup %1650 }
 0x5e7   :  { %486 = vrot.lane.b32.xlu1 %v1651_v11, %s1837_s6 }
 0x659   :  { %v487_v12 = vpop.permute.xlu1 %486 }
 0x65a   :  { %v489_v15 = vmul.f32 %v1649_v2, %v487_v12 }
 0x65c   :  { %v491_v16 = vrot.slane %v489_v15, 2  ;;  %v1157_v42 = vrot.slane %v489_v15, 1 }
 0x65e   :  { %492 = vrot.lane.b32.xlu0 %v491_v16, %s1838_s20  ;;  %v1185_v49 = vsel %vm1184_vm8, %v2026_v55, %v1157_v42  ;;  %v1198_v50 = vsel %vm1184_vm8, %v1171_v45, %v491_v16 }
 0x6d0   :  { %v493_v19 = vpop.permute.xlu0 %492 }
 0x6d1   :  { %1488 = vmatmul.mubr.msk.f32.vlgmr.msra.gmra.mrb[4].mxu1 %vm80_vm0, %v493_v19 }
 0x6d2   :  { %1594 = vmatpush3.bf16.msra.mxu1 %v1975_v13  ;;  %1509 = vmatprep.mubr.msk.f32.mxu1 %vm1835_vm1, %v1836_v18 }
 0x6d3   :  { %1595 = vmatprep.subr.bf16.mxu1 %v1834_v14 }
 0x6d6   :  { %1597 = vmatpush3.bf16.msra.mxu1 %v1986_v17 }
 0x6d7   :  { %1604 = vmatprep.subr.bf16.mxu1 %v1834_v14 }
 0x7a4   :  { %v562_v20 = vpop.f32.mrb[4].mxu1 }
 0x7a5   :  { %v567_v21 = vrot.slane %v562_v20, 4  ;;  %v1489_v22 = vpop.f32.mrb[5].mxu1 }
 0x7a7   :  { %v569_v23 = vadd.f32 %v567_v21, %v2013_v33 }
 0x7a9   :  { %v570_v24 = vmul.f32 2.0, %v569_v23 }
 0x7ab   :  { %v571_v25 = vsel %vm2016_vm7, %v570_v24, %v569_v23 }
 0x7ac   :  { %v1363_v26 = vmul.f32 -1.442695, %v571_v25 }
 0x7ae   :  { %1652 = vpow2.f32 %v1363_v26 }
 0x7b8   :  { %v1653_v27 = vpop.eup %1652 }
 0x7b9   :  { %v575_v28 = vadd.f32 1.0, %v1653_v27 }
 0x7bb   :  { %1654 = vrcp.f32 %v575_v28 }
 0x7c5   :  { %v1655_v29 = vpop.eup %1654 }
 0x7c6   :  { %v578_v30 = vmul.f32 2.0, %v1655_v29  ;;  %v583_v38 = vmul.f32 %v1655_v29, %v581_v36 }
 0x7c8   :  { %v1364_v32 = vadd.f32 -1.0, %v578_v30 }
 0x7ca   :  { %585 = vrot.lane.b32.xlu1 %v1364_v32, %s1837_s6 }
 0x83c   :  { %v586_v34 = vpop.permute.xlu1 %585 }
 0x83d   :  { %v588_v35 = vmul.f32 %v1655_v29, %v586_v34 }
 0x83f   :  { %590 = vrot.lane.b32.xlu0 %v588_v35, %s1838_s20 }
 0x8b1   :  { %v591_v39 = vpop.permute.xlu0 %590 }
 0x8b2   :  { %v593_v40 = vadd.f32 %v591_v39, %v583_v38 }
 0x8b4   :  { %1656 = vtanh.f32 %v593_v40  ;;  %v691_v4 = vrot.slane %v593_v40, 6 }
 0x8be   :  { %v1657_v41 = vpop.eup %1656 }
 0x8bf   :  { %596 = vrot.lane.b32.xlu1 %v1657_v41, %s1837_s6 }
 0x931   :  { %v597_v43 = vpop.permute.xlu1 %596 }
 0x932   :  { %v599_v44 = vmul.f32 %v1655_v29, %v597_v43 }
 0x934   :  { %v1159_v46 = vrot.slane %v599_v44, 2  ;;  %v1174_v47 = vrot.slane %v599_v44, 3  ;;  %v601_v48 = vrot.slane %v599_v44, 4 }
 0x936   :  { %v1187_v51 = vsel %vm1186_vm9, %v1185_v49, %v1159_v46  ;;  %v1199_v52 = vsel %vm1186_vm9, %v1198_v50, %v1174_v47  ;;  %602 = vrot.lane.b32.xlu0 %v601_v48, %s1838_s20 }
 0x9a8   :  { %v603_v53 = vpop.permute.xlu0 %602 }
 0x9a9   :  { %1499 = vmatmul.mubr.msk.f32.vlgmr.msra.gmra.mrb[4].mxu0 %vm80_vm0, %v603_v53 }
 0x9aa   :  { %1600 = vmatpush3.bf16.msra.mxu0 %v1975_v13  ;;  %1520 = vmatprep.mubr.msk.f32.mxu0 %vm1835_vm1, %v1836_v18 }
 0x9ab   :  { %1601 = vmatprep.subr.bf16.mxu0 %v1834_v14 }
 0x9ae   :  { %1603 = vmatpush3.bf16.msra.mxu0 %v1986_v17 }
 0x9af   :  { %1610 = vmatprep.subr.bf16.mxu0 %v1834_v14 }
 0xa7c   :  { %v672_v54 = vpop.f32.mrb[4].mxu0 }
 0xa7d   :  { %v677_v55 = vrot.slane %v672_v54, 2  ;;  %v1500_v56 = vpop.f32.mrb[5].mxu0 }
 0xa7f   :  { %v679_v57 = vadd.f32 %v677_v55, %v2013_v33 }
 0xa81   :  { %v680_v58 = vmul.f32 2.0, %v679_v57 }
 0xa83   :  { %v681_v59 = vsel %vm2016_vm7, %v680_v58, %v679_v57 }
 0xa84   :  { %v1366_v60 = vmul.f32 -1.442695, %v681_v59 }
 0xa86   :  { %1658 = vpow2.f32 %v1366_v60 }
 0xa90   :  { %v1659_v61 = vpop.eup %1658 }
 0xa91   :  { %v685_v62 = vadd.f32 1.0, %v1659_v61 }
 0xa93   :  { %1660 = vrcp.f32 %v685_v62 }
 0xa9d   :  { %v1661_v63 = vpop.eup %1660 }
 0xa9e   :  { %v688_v0 = vmul.f32 2.0, %v1661_v63  ;;  %v693_v33 = vmul.f32 %v1661_v63, %v691_v4 }
 0xaa0   :  { %v1367_v1 = vadd.f32 -1.0, %v688_v0 }
 0xaa2   :  { %695 = vrot.lane.b32.xlu1 %v1367_v1, %s1837_s6 }
 0xb14   :  { %v696_v2 = vpop.permute.xlu1 %695 }
 0xb15   :  { %v698_v3 = vmul.f32 %v1661_v63, %v696_v2 }
 0xb17   :  { %700 = vrot.lane.b32.xlu0 %v698_v3, %s1838_s20 }
 0xb89   :  { %v701_v5 = vpop.permute.xlu0 %700 }
 0xb8a   :  { %v703_v6 = vadd.f32 %v701_v5, %v693_v33 }
 0xb8c   :  { %1662 = vtanh.f32 %v703_v6  ;;  %v798_v35 = vrot.slane %v703_v6, 6 }
 0xb96   :  { %v1663_v7 = vpop.eup %1662 }
 0xb97   :  { %706 = vrot.lane.b32.xlu1 %v1663_v7, %s1837_s6 }
 0xc09   :  { %v707_v8 = vpop.permute.xlu1 %706 }
 0xc0a   :  { %v709_v9 = vmul.f32 %v1661_v63, %v707_v8 }
 0xc0c   :  { %v1161_v10 = vrot.slane %v709_v9, 3  ;;  %v1176_v11 = vrot.slane %v709_v9, 4  ;;  %v711_v12 = vrot.slane %v709_v9, 6 }
 0xc0e   :  { %v1189_v15 = vsel %vm1188_vm10, %v1187_v51, %v1161_v10  ;;  %v1200_v16 = vsel %vm1188_vm10, %v1199_v52, %v1176_v11  ;;  %712 = vrot.lane.b32.xlu0 %v711_v12, %s1838_s20 }
 0xc80   :  { %v713_v19 = vpop.permute.xlu0 %712 }
 0xc81   :  { %1510 = vmatmul.mubr.msk.f32.vlgmr.msra.gmra.mrb[6].mxu1 %vm80_vm0, %v713_v19 }
 0xc82   :  { %1606 = vmatpush3.bf16.msra.mxu1 %v1975_v13  ;;  %1531 = vmatprep.mubr.msk.f32.mxu1 %vm1835_vm1, %v1836_v18 }
 0xc83   :  { %1607 = vmatprep.subr.bf16.mxu1 %v1834_v14 }
 0xc86   :  { %1609 = vmatpush3.bf16.msra.mxu1 %v1986_v17 }
 0xd54   :  { %v782_v20 = vpop.f32.mrb[6].mxu1 }
 0xd55   :  { %v786_v21 = vadd.f32 %v782_v20, %v2011_v31  ;;  %v1511_v22 = vpop.f32.mrb[7].mxu1 }
 0xd57   :  { %v787_v23 = vmul.f32 2.0, %v786_v21 }
 0xd59   :  { %v788_v24 = vsel %vm2016_vm7, %v787_v23, %v786_v21 }
 0xd5a   :  { %v1369_v25 = vmul.f32 -1.442695, %v788_v24 }
 0xd5c   :  { %1664 = vpow2.f32 %v1369_v25 }
 0xd66   :  { %v1665_v26 = vpop.eup %1664 }
 0xd67   :  { %v792_v27 = vadd.f32 1.0, %v1665_v26 }
 0xd69   :  { %1666 = vrcp.f32 %v792_v27 }
 0xd73   :  { %v1667_v28 = vpop.eup %1666 }
 0xd74   :  { %v795_v29 = vmul.f32 2.0, %v1667_v28  ;;  %v800_v36 = vmul.f32 %v1667_v28, %v798_v35 }
 0xd76   :  { %v1370_v30 = vadd.f32 -1.0, %v795_v29 }
 0xd78   :  { %802 = vrot.lane.b32.xlu1 %v1370_v30, %s1837_s6 }
 0xdea   :  { %v803_v32 = vpop.permute.xlu1 %802 }
 0xdeb   :  { %v805_v34 = vmul.f32 %v1667_v28, %v803_v32 }
 0xded   :  { %807 = vrot.lane.b32.xlu0 %v805_v34, %s1838_s20 }
 0xe5f   :  { %v808_v38 = vpop.permute.xlu0 %807 }
 0xe60   :  { %v810_v39 = vadd.f32 %v808_v38, %v800_v36 }
 0xe62   :  { %1668 = vtanh.f32 %v810_v39  ;;  %v907_v58 = vrot.slane %v810_v39, 6 }
 0xe6c   :  { %v1669_v40 = vpop.eup %1668 }
 0xe6d   :  { %813 = vrot.lane.b32.xlu1 %v1669_v40, %s1837_s6 }
 0xedf   :  { %v814_v41 = vpop.permute.xlu1 %813 }
 0xee0   :  { %v816_v42 = vmul.f32 %v1667_v28, %v814_v41 }
 0xee2   :  { %v1163_v43 = vrot.slane %v816_v42, 4  ;;  %v1178_v44 = vrot.slane %v816_v42, 5  ;;  %818 = vrot.lane.b32.xlu0 %v816_v42, %s1838_s20 }
 0xee4   :  { %v1201_v45 = vsel %vm1190_vm11, %v1200_v16, %v1178_v44  ;;  %v1191_v46 = vsel %vm1190_vm11, %v1189_v15, %v1163_v43 }
 0xf54   :  { %v819_v47 = vpop.permute.xlu0 %818 }
 0xf55   :  { %1521 = vmatmul.mubr.msk.f32.vlgmr.msra.gmra.mrb[6].mxu0 %vm80_vm0, %v819_v47 }
 0xf56   :  { %1612 = vmatpush3.bf16.msra.mxu0 %v1975_v13  ;;  %1542 = vmatprep.mubr.msk.f32.mxu0 %vm1835_vm1, %v1836_v18 }
 0xf57   :  { %1613 = vmatprep.subr.bf16.mxu0 %v1834_v14 }
 0xf5a   :  { %1615 = vmatpush3.bf16.msra.mxu0 %v1986_v17 }
0x1028   :  { %v888_v48 = vpop.f32.mrb[6].mxu0 }
0x1029   :  { %v893_v49 = vrot.slane %v888_v48, 6  ;;  %v1522_v50 = vpop.f32.mrb[7].mxu0 }
0x102b   :  { %v895_v51 = vadd.f32 %v893_v49, %v2011_v31 }
0x102d   :  { %v896_v52 = vmul.f32 2.0, %v895_v51 }
0x102f   :  { %v897_v53 = vsel %vm2016_vm7, %v896_v52, %v895_v51 }
0x1030   :  { %v1372_v54 = vmul.f32 -1.442695, %v897_v53 }
0x1032   :  { %1670 = vpow2.f32 %v1372_v54 }
0x103c   :  { %v1671_v55 = vpop.eup %1670 }
0x103d   :  { %v901_v13 = vadd.f32 1.0, %v1671_v55 }
0x103f   :  { %1672 = vrcp.f32 %v901_v13 }
0x1049   :  { %v1673_v56 = vpop.eup %1672 }
0x104a   :  { %v904_v18 = vmul.f32 2.0, %v1673_v56  ;;  %v909_v59 = vmul.f32 %v1673_v56, %v907_v58 }
0x104c   :  { %v1373_v57 = vadd.f32 -1.0, %v904_v18  ;;  %v1207_v18 = vld [vmem:[%s2181_s7 + $0x10] sm:$0xff] }
0x104e   :  { %911 = vrot.lane.b32.xlu1 %v1373_v57, %s1837_s6 }
0x10c0   :  { %v912_v14 = vpop.permute.xlu1 %911 }
0x10c1   :  { %v914_v17 = vmul.f32 %v1673_v56, %v912_v14  ;;  %v1208_v14 = vld [vmem:[%s2181_s7 + $0x18] sm:$0xff] }
0x10c3   :  { %916 = vrot.lane.b32.xlu0 %v914_v17, %s1838_s20  ;;  %v1620_v17 = vpack.c.bf16 %v1208_v14, %v1207_v18 }
0x1135   :  { %v917_v60 = vpop.permute.xlu0 %916 }
0x1136   :  { %v919_v61 = vadd.f32 %v917_v60, %v909_v59 }
0x1138   :  { %1674 = vtanh.f32 %v919_v61  ;;  %v1017_v24 = vrot.slane %v919_v61, 6 }
0x1142   :  { %v1675_v62 = vpop.eup %1674 }
0x1143   :  { %922 = vrot.lane.b32.xlu1 %v1675_v62, %s1837_s6 }
0x11b5   :  { %v923_v63 = vpop.permute.xlu1 %922 }
0x11b6   :  { %v925_v0 = vmul.f32 %v1673_v56, %v923_v63  ;;  %v1206_v56 = vld [vmem:[%s2181_s7 + $0x8] sm:$0xff]  ;;  %s1840_s7 = smov [#allocation9]  }
0x11b7   :  { %v1616_v57 = vpack.c.bf16 %v1206_v56, %v1205_v37  ;;  %s1322_s25 = sshll.u32 %s1840_s7, 4  ;;  %s1323_s25 = int_to_ptr.vmem [resolvable:$true] %s1322_s25 }
0x11b8   :  { %v1165_v1 = vrot.slane %v925_v0, 5  ;;  %v1180_v2 = vrot.slane %v925_v0, 6  ;;  %v927_v3 = vrot.slane %v925_v0, 2  ;;  %s1754_s26 = scalar_lea.vmem %s1323_s25, 32  ;;  %p1759_p11 = scmp.lt.s32.totalorder %s1323_s25, %s1323_s25 }
0x11b9   :  { %1617 = vmatprep.subr.bf16.mxu1 %v1616_v57  ;;  %p1755_p10 = scmp.ne.s32.totalorder %s1323_s25, %s1754_s26  ;;  %p1760_p12 = scmp.lt.s32.totalorder %s1754_s26, %s1754_s26 }
0x11ba   :  { %928 = vrot.lane.b32.xlu0 %v927_v3, %s1838_s20  ;;  %v1202_v4 = vsel %vm1192_vm12, %v1201_v45, %v1180_v2  ;;  %v1193_v33 = vsel %vm1192_vm12, %v1191_v46, %v1165_v1 }
0x11bb   :  { %p1761_p13 = por %p1760_p12, %p1759_p11 }
0x11bd   :  { %p1762_p0 = pnand %p1761_p13, %p1755_p10 }
0x122c   :  { %v929_v5 = vpop.permute.xlu0 %928 }
0x122d   :  { %1532 = vmatmul.mubr.msk.f32.vlgmr.msra.gmra.mrb[8].mxu1 %vm80_vm0, %v929_v5 }
0x122e   :  { %1619 = vmatpush3.bf16.msra.mxu1 %v1616_v57 }
0x122f   :  { %1621 = vmatprep.subr.bf16.mxu1 %v1620_v17 }
0x1232   :  { %1623 = vmatpush3.bf16.msra.mxu1 %v1620_v17 }
0x1300   :  { %v998_v6 = vpop.f32.mrb[8].mxu1 }
0x1301   :  { %v1003_v7 = vrot.slane %v998_v6, 4  ;;  %v1533_v8 = vpop.f32.mrb[9].mxu1 }
0x1303   :  { %v1005_v9 = vadd.f32 %v1003_v7, %v2011_v31 }
0x1305   :  { %v1006_v10 = vmul.f32 2.0, %v1005_v9 }
0x1307   :  { %v1007_v11 = vsel %vm2016_vm7, %v1006_v10, %v1005_v9 }
0x1308   :  { %v1375_v12 = vmul.f32 -1.442695, %v1007_v11 }
0x130a   :  { %1676 = vpow2.f32 %v1375_v12 }
0x1314   :  { %v1677_v15 = vpop.eup %1676 }
0x1315   :  { %v1011_v16 = vadd.f32 1.0, %v1677_v15 }
0x1317   :  { %1678 = vrcp.f32 %v1011_v16 }
0x1321   :  { %v1679_v19 = vpop.eup %1678 }
0x1322   :  { %v1014_v20 = vmul.f32 2.0, %v1679_v19  ;;  %v1019_v25 = vmul.f32 %v1679_v19, %v1017_v24 }
0x1324   :  { %v1376_v21 = vadd.f32 -1.0, %v1014_v20 }
0x1326   :  { %1021 = vrot.lane.b32.xlu1 %v1376_v21, %s1837_s6 }
0x1398   :  { %v1022_v22 = vpop.permute.xlu1 %1021 }
0x1399   :  { %v1024_v23 = vmul.f32 %v1679_v19, %v1022_v22 }
0x139b   :  { %1026 = vrot.lane.b32.xlu0 %v1024_v23, %s1838_s20 }
0x140d   :  { %v1027_v26 = vpop.permute.xlu0 %1026 }
0x140e   :  { %v1029_v27 = vadd.f32 %v1027_v26, %v1019_v25 }
0x1410   :  { %1680 = vtanh.f32 %v1029_v27  ;;  %v1127_v54 = vrot.slane %v1029_v27, 6 }
0x141a   :  { %v1681_v28 = vpop.eup %1680 }
0x141b   :  { %1032 = vrot.lane.b32.xlu1 %v1681_v28, %s1837_s6 }
0x148d   :  { %v1033_v29 = vpop.permute.xlu1 %1032 }
0x148e   :  { %v1035_v30 = vmul.f32 %v1679_v19, %v1033_v29 }
0x1490   :  { %v1167_v32 = vrot.slane %v1035_v30, 6  ;;  %v1182_v34 = vrot.slane %v1035_v30, 7  ;;  %v1037_v35 = vrot.slane %v1035_v30, 4 }
0x1492   :  { %1038 = vrot.lane.b32.xlu0 %v1037_v35, %s1838_s20  ;;  %v1203_v36 = vsel %vm1194_vm13, %v1202_v4, %v1182_v34  ;;  %v1195_v38 = vsel %vm1194_vm13, %v1193_v33, %v1167_v32 }
0x1504   :  { %v1039_v39 = vpop.permute.xlu0 %1038 }
0x1505   :  { %1543 = vmatmul.mubr.msk.f32.vlgmr.msra.gmra.mrb[8].mxu0 %vm80_vm0, %v1039_v39 }
0x15d8   :  { %v1108_v40 = vpop.f32.mrb[8].mxu0 }
0x15d9   :  { %v1113_v41 = vrot.slane %v1108_v40, 2  ;;  %v1544_v42 = vpop.f32.mrb[9].mxu0 }
0x15db   :  { %v1115_v43 = vadd.f32 %v1113_v41, %v2011_v31 }
0x15dd   :  { %v1116_v44 = vmul.f32 2.0, %v1115_v43 }
0x15df   :  { %v1117_v45 = vsel %vm2016_vm7, %v1116_v44, %v1115_v43 }
0x15e0   :  { %v1378_v46 = vmul.f32 -1.442695, %v1117_v45 }
0x15e2   :  { %1682 = vpow2.f32 %v1378_v46 }
0x15ec   :  { %v1683_v47 = vpop.eup %1682 }
0x15ed   :  { %v1121_v48 = vadd.f32 1.0, %v1683_v47 }
0x15ef   :  { %1684 = vrcp.f32 %v1121_v48 }
0x15f9   :  { %v1685_v49 = vpop.eup %1684 }
0x15fa   :  { %v1124_v50 = vmul.f32 2.0, %v1685_v49  ;;  %v1129_v31 = vmul.f32 %v1685_v49, %v1127_v54 }
0x15fc   :  { %v1379_v51 = vadd.f32 -1.0, %v1124_v50 }
0x15fe   :  { %1131 = vrot.lane.b32.xlu1 %v1379_v51, %s1837_s6 }
0x1670   :  { %v1132_v52 = vpop.permute.xlu1 %1131 }
0x1671   :  { %v1134_v53 = vmul.f32 %v1685_v49, %v1132_v52 }
0x1673   :  { %1136 = vrot.lane.b32.xlu0 %v1134_v53, %s1838_s20 }
0x16e5   :  { %v1137_v55 = vpop.permute.xlu0 %1136 }
0x16e6   :  { %v1139_v13 = vadd.f32 %v1137_v55, %v1129_v31 }
0x16e8   :  { %1686 = vtanh.f32 %v1139_v13 }
0x16f2   :  { %v1687_v58 = vpop.eup %1686 }
0x16f3   :  { %1142 = vrot.lane.b32.xlu1 %v1687_v58, %s1837_s6 }
0x1765   :  { %v1143_v59 = vpop.permute.xlu1 %1142 }
0x1766   :  { %v1145_v60 = vmul.f32 %v1685_v49, %v1143_v59 }
0x1768   :  { %v1169_v61 = vrot.slane %v1145_v60, 7  ;;  %v1204_v62 = vsel %vm1196_vm14, %v1203_v36, %v1145_v60 }
0x1769   :  { %1220 = vrot.lane.b32.xlu1 %v1204_v62, %s1838_s20 }
0x176a   :  { %v1197_v63 = vsel %vm1196_vm14, %v1195_v38, %v1169_v61 }
0x176b   :  { %1218 = vrot.lane.b32.xlu0 %v1197_v63, %s1838_s20 }
0x176d   :  { %1153 = vrot.lane.b32.xlu1 %v1139_v13, %s1839_s24 }
0x176f   :  { %1147 = vrot.lane.b32.xlu0 %v1145_v60, %s1838_s20 }
0x17db   :  { %v1221_v0 = vpop.permute.xlu1 %1220 }
0x17dd   :  { %v1219_v1 = vpop.permute.xlu0 %1218 }
0x17de   :  { %1553 = vmatprep.mubr.msk.f32.mxu1 %vm80_vm0, %v1219_v1 }
0x17df   :  { %1554 = vmatmul.mubr.msk.f32.vlgmr.msra.gmra.mrb[10].mxu1 %vm80_vm0, %v1221_v0  ;;  %v1154_v2 = vpop.permute.xlu1 %1153 }
0x17e0   :  { %1156 = vst.msk [vmem:[#allocation11 - $0x6] sm:$0xc0] %vm1150_vm15, %v1154_v2 }
0x17e1   :  { %v1148_v3 = vpop.permute.xlu0 %1147 }
0x17e2   :  { %1151 = vst.msk [vmem:[#allocation9 - $0x6] sm:$0xc0] %vm1150_vm15, %v1148_v3 }
0x17e3   :  { %1765 = shalt.err (!%p1762_p0)
}
0x17e4   :  { %s1766_s28 = scalar_lea.hbm %s2184_s10, 32 }
0x17e5   :  { %p1767_p1 = scmp.ne.s32.totalorder %s2184_s10, %s1766_s28  ;;  %p1770_p2 = scmp.lt.u32.totalorder %s1766_s28, %s2184_s10 }
0x17e7   :  { %p1772_p3 = pnand %p1770_p2, %p1767_p1 }
0x17e9   :  { %1775 = shalt.err (!%p1772_p3)
}
0x17ea   :  { %1325 = dma.vmem_to_hbm [thread:$0]  %s1323_s25, 32, %s2184_s10, [#allocation10]  }
0x17eb   :  { %s1841_s5 = smov [#allocation11]  }
0x17ec   :  { %s1332_s1 = sshll.u32 %s1841_s5, 4  ;;  %s1333_s1 = int_to_ptr.vmem [resolvable:$true] %s1332_s1 }
0x17ed   :  { %s1776_s6 = scalar_lea.vmem %s1333_s1, 32  ;;  %p1781_p5 = scmp.lt.s32.totalorder %s1333_s1, %s1333_s1 }
0x17ee   :  { %p1777_p4 = scmp.ne.s32.totalorder %s1333_s1, %s1776_s6  ;;  %p1782_p6 = scmp.lt.s32.totalorder %s1776_s6, %s1776_s6 }
0x17f0   :  { %p1783_p7 = por %p1782_p6, %p1781_p5 }
0x17f2   :  { %p1784_p8 = pnand %p1783_p7, %p1777_p4 }
0x17f4   :  { %1787 = shalt.err (!%p1784_p8)
}
0x17f5   :  { %s1788_s16 = scalar_lea.hbm %s2185_s11, 32 }
0x17f6   :  { %p1789_p9 = scmp.ne.s32.totalorder %s2185_s11, %s1788_s16  ;;  %p1792_p10 = scmp.lt.u32.totalorder %s1788_s16, %s2185_s11 }
0x17f8   :  { %p1794_p11 = pnand %p1792_p10, %p1789_p9 }
0x17fa   :  { %1797 = shalt.err (!%p1794_p11)
}
0x17fb   :  { %1335 = dma.vmem_to_hbm [thread:$0]  %s1333_s1, 32, %s2185_s11, [#allocation10]   ;;  %v1380_v4 = vld [vmem:[%s2182_s8] ss:$0 sm:$0xff]  ;;  %vm1301_vm0 = vcmask 80896  }
0x17fc   :  { %s1842_s7 = smov [#allocation8]  }
0x17fd   :  { %s1309_s25 = sshll.u32 %s1842_s7, 4  ;;  %s1310_s25 = int_to_ptr.vmem [resolvable:$true] %s1309_s25 }
0x17fe   :  { %s1798_s26 = scalar_lea.vmem %s1310_s25, 256  ;;  %p1803_p13 = scmp.lt.s32.totalorder %s1310_s25, %s1310_s25 }
0x17ff   :  { %p1799_p12 = scmp.ne.s32.totalorder %s1310_s25, %s1798_s26  ;;  %p1804_p0 = scmp.lt.s32.totalorder %s1798_s26, %s1798_s26 }
0x1801   :  { %p1805_p1 = por %p1804_p0, %p1803_p13 }
0x1803   :  { %p1806_p2 = pnand %p1805_p1, %p1799_p12 }
0x18b2   :  { %v1555_v33 = vpop.f32.mrb[10].mxu1 }
0x18b3   :  { %v1298_v5 = vadd.f32 %v1555_v33, %v1380_v4  ;;  %v1292_v6 = vpop.f32.mrb[11].mxu1 }
0x18b4   :  { %v1293_v7 = vadd.f32 %v1380_v4, %v1292_v6 }
0x18b5   :  { %1303 = vst.msk [vmem:[#allocation8 + $0x8] sm:$0xff] %vm1301_vm0, %v1298_v5 }
0x18b6   :  { %1302 = vst.msk [vmem:[#allocation8] sm:$0xff] %vm1301_vm0, %v1293_v7 }
0x18b7   :  { %1809 = shalt.err (!%p1806_p2)
}
0x18b8   :  { %s1810_s8 = scalar_lea.hbm %s2183_s9, 256 }
0x18b9   :  { %p1811_p3 = scmp.ne.s32.totalorder %s2183_s9, %s1810_s8  ;;  %p1814_p4 = scmp.lt.u32.totalorder %s1810_s8, %s2183_s9 }
0x18bb   :  { %p1816_p5 = pnand %p1814_p4, %p1811_p3 }
0x18bd   :  { %1819 = shalt.err (!%p1816_p5)
}
0x18be   :  { %1315 = dma.vmem_to_hbm [thread:$0]  %s1310_s25, 256, %s2183_s9, [#allocation4], %s1830_s2, %s1830_s2, %s1831_s18  }
0x18bf   :  { %1824 = dma.done.wait [#allocation4], 256  }
0x18c0   :  { %1825 = vsyncadd [#allocation4], 4294967040 }
0x18c1   :  { %1826 = dma.done.wait [#allocation10], 64  }
0x18c2   :  { %1827 = vsyncadd [#allocation10], 4294967232 }
0x18c3   :  { %1345 = vsyncpa [#allocation3], 1 }
0x18c4   :  { %1346 = vsyncpa [#allocation6], 1 }
0x18c5   :  { %1347 = vsyncpa [#allocation4], 1 }
0x18c6   :  { %1348 = vsyncpa [#allocation10], 1 }

</bundles_post_ra>
